<compile_context>
chip_gen: v7x
topology: tpu7x:2x2x1
jax: 0.10.0
libtpu: 0.0.40
codegen_flags: <defaults>
</compile_context>

<pallas_src>
import jax
import jax.numpy as jnp
from jax.experimental import pallas as pl
from jax.experimental.pallas import tpu as pltpu

C_IN = 6
C_OUT = 3
KH = KW = 16
STRIDE = 16
K = C_IN * KH * KW          # 1536 (multiple of 128)
N_PAD = 128                 # lane-dense output-channel padding


def _round_up(x, m):
    return ((x + m - 1) // m) * m


def _conv_tanh_kernel(p_ref, w_ref, o_ref):
    # p_ref: (TILE_M, K) patch tile, w_ref: (K, N_PAD) zero-padded weights,
    # o_ref: (TILE_M, N_PAD)
    acc = jnp.dot(p_ref[...], w_ref[...], preferred_element_type=jnp.float32)
    o_ref[...] = jnp.tanh(acc).astype(o_ref.dtype)


def conv_tanh_pallas(x_nchw, weight, *, tile_m=1024):
    """x_nchw: (B, 6, H, W) float32; weight: (3, 6, 16, 16) float32."""
    B, C, H, W = x_nchw.shape
    assert C == C_IN
    OH, OW = H // STRIDE, W // STRIDE
    M = B * OH * OW

    # ---- glue: im2col (non-overlapping patches), NCHW -> (M, K) ----
    # TODO(synk): fuse patch extraction into the kernel (per-channel grid
    # reduction or in-VMEM reorder) to cut HBM traffic ~3x -> 1x; kept in JAX
    # here because the required in-kernel multi-dim transpose/reshape is a
    # Mosaic lowering risk.
    xp = x_nchw.reshape(B, C, OH, KH, OW, KW)
    xp = jnp.transpose(xp, (0, 2, 4, 1, 3, 5))     # (B, OH, OW, C, KH, KW)
    patches = xp.reshape(M, K)

    # ---- tile / pad M so every block is full and (8,128)-legal ----
    m8 = _round_up(M, 8)
    tile_m = min(_round_up(int(tile_m), 8), m8)     # don't tile bigger than needed
    m_pad = _round_up(m8, tile_m)                   # pad to a multiple of tile_m
    if m_pad != M:
        patches = jnp.pad(patches, ((0, m_pad - M), (0, 0)))

    # weight (C_OUT, C_IN, KH, KW) -> (K, C_OUT), zero-pad N to 128 lanes
    w2d = weight.reshape(C_OUT, K).T
    w2d = jnp.pad(w2d, ((0, 0), (0, N_PAD - C_OUT)))

    num_tiles = m_pad // tile_m

    cost = pl.CostEstimate(
        flops=2 * m_pad * K * C_OUT,
        transcendentals=m_pad * N_PAD,
        bytes_accessed=m_pad * K * 4 + K * N_PAD * 4 + m_pad * N_PAD * 4,
    )

    out_padded = pl.pallas_call(
        _conv_tanh_kernel,
        out_shape=jax.ShapeDtypeStruct((m_pad, N_PAD), jnp.float32),
        grid_spec=pltpu.PrefetchScalarGridSpec(
            num_scalar_prefetch=0,
            grid=(num_tiles,),
            in_specs=[
                pl.BlockSpec((tile_m, K), lambda i: (i, 0)),      # patch tile stream
                pl.BlockSpec((K, N_PAD), lambda i: (0, 0)),       # weights, resident
            ],
            out_specs=pl.BlockSpec((tile_m, N_PAD), lambda i: (i, 0)),
        ),
        compiler_params=pltpu.CompilerParams(
            dimension_semantics=("parallel",),   # independent M tiles -> megacore on v7x
        ),
        cost_estimate=cost,
    )(patches, w2d)

    # ---- glue: strip padding, back to NCHW (B, 3, OH, OW) ----
    out = out_padded[:M, :C_OUT].reshape(B, OH, OW, C_OUT)
    return jnp.transpose(out, (0, 3, 1, 2))


def conv_tanh_reference(x_nchw, weight):
    """Pure-JAX reference of Conv2d(6,3,(16,16),stride=(16,16),bias=False) + tanh."""
    y = jax.lax.conv_general_dilated(
        x_nchw, weight,
        window_strides=(STRIDE, STRIDE),
        padding="VALID",
        dimension_numbers=("NCHW", "OIHW", "NCHW"),
    )
    return jnp.tanh(y)


if __name__ == "__main__":
    key = jax.random.PRNGKey(0)
    kx, kw = jax.random.split(key)

    # Small shapes consistent with the module: batch=2, 6 channels, 32x32 spatial
    x = jax.random.normal(kx, (2, C_IN, 32, 32), dtype=jnp.float32)

    # Deterministic weight init (PyTorch default: kaiming-uniform-ish bound)
    fan_in = C_IN * KH * KW
    bound = 1.0 / (fan_in ** 0.5)
    weight = jax.random.uniform(
        kw, (C_OUT, C_IN, KH, KW), dtype=jnp.float32, minval=-bound, maxval=bound
    )

    out = conv_tanh_pallas(x, weight)
    out = jax.block_until_ready(out)

    ref = conv_tanh_reference(x, weight)
    assert out.shape == (2, C_OUT, 2, 2), out.shape
    assert jnp.allclose(out, ref, atol=1e-5, rtol=1e-5), "mismatch vs reference"

    print("KERNEL_OK")
</pallas_src>

<mosaic_0001>
module attributes {stable_mosaic.version = 11 : i64} {
  func.func @_conv_tanh_kernel(%arg0: i32, %arg1: memref<8x1536xf32, #tpu.memory_space<vmem>>, %arg2: memref<1536x128xf32, #tpu.memory_space<vmem>>, %arg3: memref<8x128xf32, #tpu.memory_space<vmem>>) attributes {dimension_semantics = [#tpu.dimension_semantics<parallel>], iteration_bounds = array<i64: 1>, scalar_prefetch = 0 : i64, scratch_operands = 0 : i64, tpu.core_type = #tpu.core_type<tc>, window_params = [{transform_indices = @transform_0, window_bounds = array<i64: 8, 1536>}, {pipeline_mode = #tpu.pipeline_mode<synchronous>, transform_indices = @transform_1, window_bounds = array<i64: 1536, 128>}, {transform_indices = @transform_2, window_bounds = array<i64: 8, 128>}]} {
    %c0 = arith.constant 0 : index
    %c0_0 = arith.constant 0 : index
    %0 = vector.load %arg1[%c0, %c0_0] : memref<8x1536xf32, #tpu.memory_space<vmem>>, vector<8x1536xf32>
    %c0_1 = arith.constant 0 : index
    %c0_2 = arith.constant 0 : index
    %1 = vector.load %arg2[%c0_1, %c0_2] : memref<1536x128xf32, #tpu.memory_space<vmem>>, vector<1536x128xf32>
    %cst = arith.constant dense<0.000000e+00> : vector<8x128xf32>
    %2 = tpu.matmul %0, %1, %cst {dimension_numbers = #tpu.dot_dimension_numbers<[1], [0], [0], [1], [0, 0, 1, 1], [], []>} : vector<8x1536xf32>, vector<1536x128xf32>, vector<8x128xf32> -> vector<8x128xf32>
    %3 = math.tanh %2 : vector<8x128xf32>
    %c0_3 = arith.constant 0 : index
    %c0_4 = arith.constant 0 : index
    %4 = vector.load %arg3[%c0_3, %c0_4] : memref<8x128xf32, #tpu.memory_space<vmem>>, vector<8x128xf32>
    tpu.vector_store %arg3[%c0_3, %c0_4], %3 {strides = array<i32>} : memref<8x128xf32, #tpu.memory_space<vmem>>, vector<8x128xf32>,
    return
  }
  func.func @transform_0(%arg0: i32) -> (i32, i32) {
    %c0_i32 = arith.constant 0 : i32
    %c0_i32_0 = arith.constant 0 : i32
    return %arg0, %c0_i32 : i32, i32
  }
  func.func @transform_1(%arg0: i32) -> (i32, i32) {
    %c0_i32 = arith.constant 0 : i32
    %c0_i32_0 = arith.constant 0 : i32
    %c0_i32_1 = arith.constant 0 : i32
    return %c0_i32, %c0_i32_0 : i32, i32
  }
  func.func @transform_2(%arg0: i32) -> (i32, i32) {
    %c0_i32 = arith.constant 0 : i32
    %c0_i32_0 = arith.constant 0 : i32
    return %arg0, %c0_i32 : i32, i32
  }
}

</mosaic_0001>

<bundles_post_ra>
// kernel: tpu_custom_call.1
= control target key start
LH: loop header
LB: loop body
LE: loop exit
PB: predicated region body
PF: predicated region fallthrough
CT: control target
= control target key end

     0   :  { %7 = vsyncpa [#allocation3], 0  ;;  %s1224_s0 = inlined_call_operand.hbm [shape: f32[8,1536], index: 0, kind: input, shape index: {}]   ;;  %s1225_s1 = inlined_call_operand.hbm [shape: f32[1536,128], index: 1, kind: input, shape index: {}]   ;;  %s1226_s2 = inlined_call_operand.hbm [shape: f32[8,128], index: 2, kind: output, shape index: {}]  }
   0x1   :  { %8 = vsyncpa [#allocation6], 0 }
   0x2   :  { %9 = vsyncpa [#allocation4], 0  ;;  %s1161_s9 = smov [#allocation2]   ;;  %s1162_s11 = smov [#allocation5]  }
   0x3   :  { %s16_s10 = sshll.u32 %s1161_s9, 4  ;;  %s25_s12 = sshll.u32 %s1162_s11, 4  ;;  %s17_s10 = int_to_ptr.vmem [resolvable:$true] %s16_s10  ;;  %s1181_s12 = int_to_ptr.vmem [resolvable:$true] %s25_s12 }
   0x4   :  { %s1089_s15 = scalar_lea.hbm %s1224_s0, 1536 }
   0x5   :  { %p1090_p0 = scmp.ne.s32.totalorder %s1224_s0, %s1089_s15  ;;  %p1093_p1 = scmp.lt.u32.totalorder %s1089_s15, %s1224_s0 }
   0x7   :  { %p1095_p2 = pnand %p1093_p1, %p1090_p0 }
   0x9   :  { %1098 = shalt.err (!%p1095_p2)
}
   0xa   :  { %s1099_s20 = scalar_lea.vmem %s17_s10, 1536  ;;  %p1104_p4 = scmp.lt.s32.totalorder %s17_s10, %s17_s10 }
   0xb   :  { %p1100_p3 = scmp.ne.s32.totalorder %s17_s10, %s1099_s20  ;;  %p1105_p5 = scmp.lt.s32.totalorder %s1099_s20, %s1099_s20 }
   0xd   :  { %p1106_p6 = por %p1105_p5, %p1104_p4 }
   0xf   :  { %p1107_p7 = pnand %p1106_p6, %p1100_p3 }
  0x11   :  { %1110 = shalt.err (!%p1107_p7)
}
  0x12   :  { %19 = dma.hbm_to_vmem [thread:$0]  %s1224_s0, 1536, %s17_s10, [#allocation3]  }
  0x13   :  { %s1111_s25 = scalar_lea.hbm %s1225_s1, 24576 }
  0x14   :  { %p1112_p8 = scmp.ne.s32.totalorder %s1225_s1, %s1111_s25  ;;  %p1115_p9 = scmp.lt.u32.totalorder %s1111_s25, %s1225_s1 }
  0x16   :  { %p1117_p10 = pnand %p1115_p9, %p1112_p8 }
  0x18   :  { %1120 = shalt.err (!%p1117_p10)
}
  0x19   :  { %s1121_s30 = scalar_lea.vmem %s1181_s12, 24576  ;;  %p1126_p12 = scmp.lt.s32.totalorder %s1181_s12, %s1181_s12 }
  0x1a   :  { %p1122_p11 = scmp.ne.s32.totalorder %s1181_s12, %s1121_s30  ;;  %p1127_p13 = scmp.lt.s32.totalorder %s1121_s30, %s1121_s30 }
  0x1c   :  { %p1128_p0 = por %p1127_p13, %p1126_p12 }
  0x1e   :  { %p1129_p1 = pnand %p1128_p0, %p1122_p11 }
  0x20   :  { %1132 = shalt.err (!%p1129_p1)
}
  0x21   :  { %s1163_s0 = smov 128   ;;  %s1164_s3 = smov 8  }
  0x22   :  { %31 = dma.hbm_to_vmem [thread:$0]  %s1225_s1, 24576, %s1181_s12, [#allocation6], %s1163_s0, %s1163_s0, %s1164_s3  }
  0x23   :  { %1155 = dma.done.wait [#allocation3], 1536  }
  0x24   :  { %1156 = vsyncadd [#allocation3], 4294965760 }
  0x25   :  { %1157 = dma.done.wait [#allocation6], 24576  }
  0x26   :  { %1158 = vsyncadd [#allocation6], 4294942720  ;;  %v66_v0 = vld [vmem:[#allocation5 + $0x80] sm:$0xff]  ;;  %v67_v1 = vld [vmem:[#allocation5 + $0x88] sm:$0xff]  ;;  %s1165_s1 = smov [#allocation7]  }
  0x27   :  { %v98_v2 = vld [vmem:[#allocation5 + $0x180] sm:$0xff]  ;;  %v890_v3 = vpack.c.bf16 %v67_v1, %v66_v0  ;;  %v99_v4 = vld [vmem:[#allocation5 + $0x188] sm:$0xff]  ;;  %v68_v11 = vld [vmem:[#allocation5 + $0x90] sm:$0xff]  ;;  %s670_s6 = sshll.u32 %s1165_s1, 4  ;;  %s671_s6 = int_to_ptr.vmem [resolvable:$true] %s670_s6 }
  0x28   :  { %v50_v5 = vld [vmem:[#allocation5] sm:$0xff]  ;;  %v51_v6 = vld [vmem:[#allocation5 + $0x8] sm:$0xff]  ;;  %v922_v7 = vpack.c.bf16 %v99_v4, %v98_v2  ;;  %v69_v13 = vld [vmem:[#allocation5 + $0x98] sm:$0xff]  ;;  %s1133_s7 = scalar_lea.vmem %s671_s6, 128  ;;  %p1138_p3 = scmp.lt.s32.totalorder %s671_s6, %s671_s6 }
  0x29   :  { %v892_v8 = vpack.c.bf16 %v51_v6, %v50_v5  ;;  %v82_v9 = vld [vmem:[#allocation5 + $0x100] sm:$0xff]  ;;  %v83_v10 = vld [vmem:[#allocation5 + $0x108] sm:$0xff]  ;;  %891 = vmatprep.subr.bf16.mxu0 %v890_v3  ;;  %v100_v14 = vld [vmem:[#allocation5 + $0x190] sm:$0xff]  ;;  %v894_v16 = vpack.c.bf16 %v69_v13, %v68_v11  ;;  %p1134_p2 = scmp.ne.s32.totalorder %s671_s6, %s1133_s7  ;;  %p1139_p4 = scmp.lt.s32.totalorder %s1133_s7, %s1133_s7 }
  0x2a   :  { %v924_v12 = vpack.c.bf16 %v83_v10, %v82_v9  ;;  %v101_v15 = vld [vmem:[#allocation5 + $0x198] sm:$0xff]  ;;  %923 = vmatprep.subr.bf16.mxu1 %v922_v7  ;;  %v52_v18 = vld [vmem:[#allocation5 + $0x10] sm:$0xff]  ;;  %v70_v23 = vld [vmem:[#allocation5 + $0xa0] sm:$0xff] }
  0x2b   :  { %893 = vmatpush3.bf16.msra.mxu0 %v892_v8  ;;  %v926_v17 = vpack.c.bf16 %v101_v15, %v100_v14  ;;  %v53_v19 = vld [vmem:[#allocation5 + $0x18] sm:$0xff]  ;;  %v84_v20 = vld [vmem:[#allocation5 + $0x110] sm:$0xff]  ;;  %v71_v24 = vld [vmem:[#allocation5 + $0xa8] sm:$0xff]  ;;  %p1140_p5 = por %p1139_p4, %p1138_p3 }
  0x2c   :  { %925 = vmatpush3.bf16.msra.mxu1 %v924_v12  ;;  %v896_v21 = vpack.c.bf16 %v53_v19, %v52_v18  ;;  %v85_v22 = vld [vmem:[#allocation5 + $0x118] sm:$0xff]  ;;  %895 = vmatprep.subr.bf16.mxu0 %v894_v16  ;;  %v898_v26 = vpack.c.bf16 %v71_v24, %v70_v23  ;;  %v102_v27 = vld [vmem:[#allocation5 + $0x1a0] sm:$0xff]  ;;  %v103_v28 = vld [vmem:[#allocation5 + $0x1a8] sm:$0xff] }
  0x2d   :  { %927 = vmatprep.subr.bf16.mxu1 %v926_v17  ;;  %v928_v25 = vpack.c.bf16 %v85_v22, %v84_v20  ;;  %v54_v29 = vld [vmem:[#allocation5 + $0x20] sm:$0xff]  ;;  %v930_v30 = vpack.c.bf16 %v103_v28, %v102_v27  ;;  %v55_v31 = vld [vmem:[#allocation5 + $0x28] sm:$0xff]  ;;  %v72_v35 = vld [vmem:[#allocation5 + $0xb0] sm:$0xff]  ;;  %p1141_p6 = pnand %p1140_p5, %p1134_p2 }
  0x2e   :  { %v86_v32 = vld [vmem:[#allocation5 + $0x120] sm:$0xff]  ;;  %v87_v33 = vld [vmem:[#allocation5 + $0x128] sm:$0xff]  ;;  %v900_v34 = vpack.c.bf16 %v55_v31, %v54_v29  ;;  %v73_v36 = vld [vmem:[#allocation5 + $0xb8] sm:$0xff] }
  0x2f   :  { %897 = vmatpush3.bf16.msra.mxu0 %v896_v21  ;;  %v104_v37 = vld [vmem:[#allocation5 + $0x1b0] sm:$0xff]  ;;  %v932_v38 = vpack.c.bf16 %v87_v33, %v86_v32  ;;  %v902_v39 = vpack.c.bf16 %v73_v36, %v72_v35  ;;  %v105_v40 = vld [vmem:[#allocation5 + $0x1b8] sm:$0xff]  ;;  %v74_v46 = vld [vmem:[#allocation5 + $0xc0] sm:$0xff] }
  0x30   :  { %929 = vmatpush3.bf16.msra.mxu1 %v928_v25  ;;  %899 = vmatprep.subr.bf16.mxu0 %v898_v26  ;;  %v56_v41 = vld [vmem:[#allocation5 + $0x30] sm:$0xff]  ;;  %v57_v42 = vld [vmem:[#allocation5 + $0x38] sm:$0xff]  ;;  %v934_v43 = vpack.c.bf16 %v105_v40, %v104_v37  ;;  %v75_v47 = vld [vmem:[#allocation5 + $0xc8] sm:$0xff] }
  0x31   :  { %931 = vmatprep.subr.bf16.mxu1 %v930_v30  ;;  %v88_v44 = vld [vmem:[#allocation5 + $0x130] sm:$0xff]  ;;  %v89_v45 = vld [vmem:[#allocation5 + $0x138] sm:$0xff]  ;;  %v106_v48 = vld [vmem:[#allocation5 + $0x1c0] sm:$0xff]  ;;  %v904_v50 = vpack.c.bf16 %v57_v42, %v56_v41  ;;  %v906_v52 = vpack.c.bf16 %v75_v47, %v74_v46 }
  0x32   :  { %v107_v49 = vld [vmem:[#allocation5 + $0x1c8] sm:$0xff]  ;;  %v936_v51 = vpack.c.bf16 %v89_v45, %v88_v44  ;;  %v58_v53 = vld [vmem:[#allocation5 + $0x40] sm:$0xff]  ;;  %v76_v58 = vld [vmem:[#allocation5 + $0xd0] sm:$0xff] }
  0x33   :  { %901 = vmatpush3.bf16.msra.mxu0 %v900_v34  ;;  %v59_v54 = vld [vmem:[#allocation5 + $0x48] sm:$0xff]  ;;  %v90_v55 = vld [vmem:[#allocation5 + $0x140] sm:$0xff]  ;;  %v938_v56 = vpack.c.bf16 %v107_v49, %v106_v48  ;;  %v77_v59 = vld [vmem:[#allocation5 + $0xd8] sm:$0xff] }
  0x34   :  { %933 = vmatpush3.bf16.msra.mxu1 %v932_v38  ;;  %903 = vmatprep.subr.bf16.mxu0 %v902_v39  ;;  %v91_v57 = vld [vmem:[#allocation5 + $0x148] sm:$0xff]  ;;  %v108_v60 = vld [vmem:[#allocation5 + $0x1d0] sm:$0xff]  ;;  %v109_v61 = vld [vmem:[#allocation5 + $0x1d8] sm:$0xff]  ;;  %v908_v62 = vpack.c.bf16 %v59_v54, %v58_v53  ;;  %v910_v0 = vpack.c.bf16 %v77_v59, %v76_v58 }
  0x35   :  { %935 = vmatprep.subr.bf16.mxu1 %v934_v43  ;;  %v940_v63 = vpack.c.bf16 %v91_v57, %v90_v55  ;;  %v60_v1 = vld [vmem:[#allocation5 + $0x50] sm:$0xff]  ;;  %v61_v2 = vld [vmem:[#allocation5 + $0x58] sm:$0xff]  ;;  %v942_v4 = vpack.c.bf16 %v109_v61, %v108_v60  ;;  %v78_v6 = vld [vmem:[#allocation5 + $0xe0] sm:$0xff] }
  0x36   :  { %v92_v3 = vld [vmem:[#allocation5 + $0x150] sm:$0xff]  ;;  %v93_v5 = vld [vmem:[#allocation5 + $0x158] sm:$0xff]  ;;  %v79_v7 = vld [vmem:[#allocation5 + $0xe8] sm:$0xff]  ;;  %v912_v10 = vpack.c.bf16 %v61_v2, %v60_v1 }
  0x37   :  { %905 = vmatpush3.bf16.msra.mxu0 %v904_v50  ;;  %v110_v8 = vld [vmem:[#allocation5 + $0x1e0] sm:$0xff]  ;;  %v111_v9 = vld [vmem:[#allocation5 + $0x1e8] sm:$0xff]  ;;  %v944_v13 = vpack.c.bf16 %v93_v5, %v92_v3  ;;  %v914_v14 = vpack.c.bf16 %v79_v7, %v78_v6  ;;  %v41_v17 = vld [vmem:[#allocation2 + $0x18] sm:$0xff] }
  0x38   :  { %937 = vmatpush3.bf16.msra.mxu1 %v936_v51  ;;  %907 = vmatprep.subr.bf16.mxu0 %v906_v52  ;;  %v62_v11 = vld [vmem:[#allocation5 + $0x60] sm:$0xff]  ;;  %v63_v12 = vld [vmem:[#allocation5 + $0x68] sm:$0xff]  ;;  %v946_v18 = vpack.c.bf16 %v111_v9, %v110_v8  ;;  %v80_v20 = vld [vmem:[#allocation5 + $0xf0] sm:$0xff] }
  0x39   :  { %939 = vmatprep.subr.bf16.mxu1 %v938_v56  ;;  %v94_v15 = vld [vmem:[#allocation5 + $0x160] sm:$0xff]  ;;  %v39_v16 = vld [vmem:[#allocation2 + $0x8] sm:$0xff]  ;;  %v81_v21 = vld [vmem:[#allocation5 + $0xf8] sm:$0xff]  ;;  %376 = vmatprep.mubr.f32.mxu1 %v41_v17  ;;  %v916_v24 = vpack.c.bf16 %v63_v12, %v62_v11 }
  0x3a   :  { %v95_v19 = vld [vmem:[#allocation5 + $0x168] sm:$0xff]  ;;  %306 = vmatprep.mubr.f32.mxu0 %v39_v16  ;;  %v112_v22 = vld [vmem:[#allocation5 + $0x1f0] sm:$0xff]  ;;  %v113_v23 = vld [vmem:[#allocation5 + $0x1f8] sm:$0xff]  ;;  %v918_v26 = vpack.c.bf16 %v81_v21, %v80_v20 }
  0x3b   :  { %909 = vmatpush3.bf16.msra.mxu0 %v908_v62  ;;  %v948_v25 = vpack.c.bf16 %v95_v19, %v94_v15  ;;  %v64_v27 = vld [vmem:[#allocation5 + $0x70] sm:$0xff]  ;;  %v65_v28 = vld [vmem:[#allocation5 + $0x78] sm:$0xff]  ;;  %v950_v30 = vpack.c.bf16 %v113_v23, %v112_v22  ;;  %v130_v32 = vld [vmem:[#allocation5 + $0x280] sm:$0xff] }
  0x3c   :  { %941 = vmatpush3.bf16.msra.mxu1 %v940_v63  ;;  %911 = vmatprep.subr.bf16.mxu0 %v910_v0  ;;  %v96_v29 = vld [vmem:[#allocation5 + $0x170] sm:$0xff]  ;;  %v97_v31 = vld [vmem:[#allocation5 + $0x178] sm:$0xff]  ;;  %v131_v33 = vld [vmem:[#allocation5 + $0x288] sm:$0xff]  ;;  %v920_v36 = vpack.c.bf16 %v65_v28, %v64_v27 }
  0x3d   :  { %943 = vmatprep.subr.bf16.mxu1 %v942_v4  ;;  %v162_v34 = vld [vmem:[#allocation5 + $0x380] sm:$0xff]  ;;  %v163_v35 = vld [vmem:[#allocation5 + $0x388] sm:$0xff]  ;;  %v952_v37 = vpack.c.bf16 %v97_v31, %v96_v29  ;;  %v954_v38 = vpack.c.bf16 %v131_v33, %v130_v32  ;;  %v132_v44 = vld [vmem:[#allocation5 + $0x290] sm:$0xff] }
  0x3e   :  { %v114_v39 = vld [vmem:[#allocation5 + $0x200] sm:$0xff]  ;;  %v115_v40 = vld [vmem:[#allocation5 + $0x208] sm:$0xff]  ;;  %v986_v42 = vpack.c.bf16 %v163_v35, %v162_v34  ;;  %v133_v45 = vld [vmem:[#allocation5 + $0x298] sm:$0xff] }
  0x3f   :  { %913 = vmatpush3.bf16.msra.mxu0 %v912_v10  ;;  %v146_v41 = vld [vmem:[#allocation5 + $0x300] sm:$0xff]  ;;  %v147_v43 = vld [vmem:[#allocation5 + $0x308] sm:$0xff]  ;;  %v164_v46 = vld [vmem:[#allocation5 + $0x390] sm:$0xff]  ;;  %v956_v50 = vpack.c.bf16 %v115_v40, %v114_v39  ;;  %v958_v52 = vpack.c.bf16 %v133_v45, %v132_v44 }
  0x40   :  { %945 = vmatpush3.bf16.msra.mxu1 %v944_v13  ;;  %915 = vmatprep.subr.bf16.mxu0 %v914_v14  ;;  %v165_v47 = vld [vmem:[#allocation5 + $0x398] sm:$0xff]  ;;  %v38_v48 = vld [vmem:[#allocation2] sm:$0xff]  ;;  %v40_v49 = vld [vmem:[#allocation2 + $0x10] sm:$0xff]  ;;  %v988_v51 = vpack.c.bf16 %v147_v43, %v146_v41 }
  0x41   :  { %947 = vmatprep.subr.bf16.mxu1 %v946_v18  ;;  %v116_v53 = vld [vmem:[#allocation5 + $0x210] sm:$0xff]  ;;  %v117_v54 = vld [vmem:[#allocation5 + $0x218] sm:$0xff]  ;;  %v990_v56 = vpack.c.bf16 %v165_v47, %v164_v46  ;;  %v134_v58 = vld [vmem:[#allocation5 + $0x2a0] sm:$0xff] }
  0x42   :  { %v148_v55 = vld [vmem:[#allocation5 + $0x310] sm:$0xff]  ;;  %v149_v57 = vld [vmem:[#allocation5 + $0x318] sm:$0xff]  ;;  %v135_v59 = vld [vmem:[#allocation5 + $0x2a8] sm:$0xff]  ;;  %v960_v62 = vpack.c.bf16 %v117_v54, %v116_v53 }
  0x43   :  { %917 = vmatpush3.bf16.msra.mxu0 %v916_v24  ;;  %v166_v60 = vld [vmem:[#allocation5 + $0x3a0] sm:$0xff]  ;;  %v167_v61 = vld [vmem:[#allocation5 + $0x3a8] sm:$0xff]  ;;  %v992_v63 = vpack.c.bf16 %v149_v57, %v148_v55  ;;  %v962_v0 = vpack.c.bf16 %v135_v59, %v134_v58  ;;  %v136_v6 = vld [vmem:[#allocation5 + $0x2b0] sm:$0xff] }
  0x44   :  { %949 = vmatpush3.bf16.msra.mxu1 %v948_v25  ;;  %919 = vmatprep.subr.bf16.mxu0 %v918_v26  ;;  %v118_v1 = vld [vmem:[#allocation5 + $0x220] sm:$0xff]  ;;  %v119_v2 = vld [vmem:[#allocation5 + $0x228] sm:$0xff]  ;;  %v994_v4 = vpack.c.bf16 %v167_v61, %v166_v60  ;;  %v137_v7 = vld [vmem:[#allocation5 + $0x2b8] sm:$0xff] }
  0x45   :  { %951 = vmatprep.subr.bf16.mxu1 %v950_v30  ;;  %v150_v3 = vld [vmem:[#allocation5 + $0x320] sm:$0xff]  ;;  %v151_v5 = vld [vmem:[#allocation5 + $0x328] sm:$0xff]  ;;  %v168_v8 = vld [vmem:[#allocation5 + $0x3b0] sm:$0xff]  ;;  %v964_v10 = vpack.c.bf16 %v119_v2, %v118_v1  ;;  %v966_v12 = vpack.c.bf16 %v137_v7, %v136_v6 }
  0x46   :  { %v169_v9 = vld [vmem:[#allocation5 + $0x3b8] sm:$0xff]  ;;  %v996_v11 = vpack.c.bf16 %v151_v5, %v150_v3  ;;  %v120_v13 = vld [vmem:[#allocation5 + $0x230] sm:$0xff]  ;;  %v138_v18 = vld [vmem:[#allocation5 + $0x2c0] sm:$0xff] }
  0x47   :  { %921 = vmatpush3.bf16.msra.mxu0 %v920_v36  ;;  %v121_v14 = vld [vmem:[#allocation5 + $0x238] sm:$0xff]  ;;  %v152_v15 = vld [vmem:[#allocation5 + $0x330] sm:$0xff]  ;;  %v998_v16 = vpack.c.bf16 %v169_v9, %v168_v8  ;;  %v139_v19 = vld [vmem:[#allocation5 + $0x2c8] sm:$0xff] }
  0x48   :  { %953 = vmatpush3.bf16.msra.mxu1 %v952_v37  ;;  %955 = vmatprep.subr.bf16.mxu0 %v954_v38  ;;  %v153_v17 = vld [vmem:[#allocation5 + $0x338] sm:$0xff]  ;;  %v170_v20 = vld [vmem:[#allocation5 + $0x3c0] sm:$0xff]  ;;  %v171_v21 = vld [vmem:[#allocation5 + $0x3c8] sm:$0xff]  ;;  %v968_v22 = vpack.c.bf16 %v121_v14, %v120_v13  ;;  %v970_v26 = vpack.c.bf16 %v139_v19, %v138_v18 }
  0x49   :  { %987 = vmatprep.subr.bf16.mxu1 %v986_v42  ;;  %v122_v23 = vld [vmem:[#allocation5 + $0x240] sm:$0xff]  ;;  %v43_v24 = vld [vmem:[#allocation2 + $0x28] sm:$0xff]  ;;  %v1000_v25 = vpack.c.bf16 %v153_v17, %v152_v15  ;;  %v45_v29 = vld [vmem:[#allocation2 + $0x38] sm:$0xff]  ;;  %v1002_v30 = vpack.c.bf16 %v171_v21, %v170_v20 }
  0x4a   :  { %307 = vmatmul.mubr.f32.vlgmr.msra.gmra.mrb[0].mxu0 %v38_v48  ;;  %v123_v27 = vld [vmem:[#allocation5 + $0x248] sm:$0xff]  ;;  %v154_v28 = vld [vmem:[#allocation5 + $0x340] sm:$0xff]  ;;  %v140_v32 = vld [vmem:[#allocation5 + $0x2d0] sm:$0xff] }
  0x4b   :  { %377 = vmatmul.mubr.f32.vlgmr.msra.gmra.mrb[0].mxu1 %v40_v49  ;;  %957 = vmatpush3.bf16.msra.mxu0 %v956_v50  ;;  %v155_v31 = vld [vmem:[#allocation5 + $0x348] sm:$0xff]  ;;  %v141_v33 = vld [vmem:[#allocation5 + $0x2d8] sm:$0xff]  ;;  %v172_v34 = vld [vmem:[#allocation5 + $0x3d0] sm:$0xff]  ;;  %v972_v36 = vpack.c.bf16 %v123_v27, %v122_v23 }
  0x4c   :  { %989 = vmatpush3.bf16.msra.mxu1 %v988_v51  ;;  %959 = vmatprep.subr.bf16.mxu0 %v958_v52  ;;  %v173_v35 = vld [vmem:[#allocation5 + $0x3d8] sm:$0xff]  ;;  %v1004_v37 = vpack.c.bf16 %v155_v31, %v154_v28  ;;  %v974_v38 = vpack.c.bf16 %v141_v33, %v140_v32  ;;  %v124_v39 = vld [vmem:[#allocation5 + $0x250] sm:$0xff]  ;;  %v142_v44 = vld [vmem:[#allocation5 + $0x2e0] sm:$0xff] }
  0x4d   :  { %991 = vmatprep.subr.bf16.mxu1 %v990_v56  ;;  %446 = vmatprep.mubr.f32.mxu0 %v43_v24  ;;  %v125_v40 = vld [vmem:[#allocation5 + $0x258] sm:$0xff]  ;;  %v156_v41 = vld [vmem:[#allocation5 + $0x350] sm:$0xff]  ;;  %v1006_v42 = vpack.c.bf16 %v173_v35, %v172_v34  ;;  %v143_v45 = vld [vmem:[#allocation5 + $0x2e8] sm:$0xff] }
  0x4e   :  { %516 = vmatprep.mubr.f32.mxu1 %v45_v29  ;;  %v157_v43 = vld [vmem:[#allocation5 + $0x358] sm:$0xff]  ;;  %v174_v46 = vld [vmem:[#allocation5 + $0x3e0] sm:$0xff]  ;;  %v175_v47 = vld [vmem:[#allocation5 + $0x3e8] sm:$0xff]  ;;  %v976_v48 = vpack.c.bf16 %v125_v40, %v124_v39  ;;  %v978_v50 = vpack.c.bf16 %v143_v45, %v142_v44 }
  0x4f   :  { %961 = vmatpush3.bf16.msra.mxu0 %v960_v62  ;;  %v1008_v49 = vpack.c.bf16 %v157_v43, %v156_v41  ;;  %v126_v51 = vld [vmem:[#allocation5 + $0x260] sm:$0xff]  ;;  %v127_v52 = vld [vmem:[#allocation5 + $0x268] sm:$0xff]  ;;  %v1010_v54 = vpack.c.bf16 %v175_v47, %v174_v46  ;;  %v144_v56 = vld [vmem:[#allocation5 + $0x2f0] sm:$0xff] }
  0x50   :  { %993 = vmatpush3.bf16.msra.mxu1 %v992_v63  ;;  %963 = vmatprep.subr.bf16.mxu0 %v962_v0  ;;  %v158_v53 = vld [vmem:[#allocation5 + $0x360] sm:$0xff]  ;;  %v159_v55 = vld [vmem:[#allocation5 + $0x368] sm:$0xff]  ;;  %v145_v57 = vld [vmem:[#allocation5 + $0x2f8] sm:$0xff]  ;;  %v980_v60 = vpack.c.bf16 %v127_v52, %v126_v51 }
  0x51   :  { %995 = vmatprep.subr.bf16.mxu1 %v994_v4  ;;  %v176_v58 = vld [vmem:[#allocation5 + $0x3f0] sm:$0xff]  ;;  %v177_v59 = vld [vmem:[#allocation5 + $0x3f8] sm:$0xff]  ;;  %v1012_v61 = vpack.c.bf16 %v159_v55, %v158_v53  ;;  %v982_v62 = vpack.c.bf16 %v145_v57, %v144_v56  ;;  %v194_v4 = vld [vmem:[#allocation5 + $0x480] sm:$0xff] }
  0x52   :  { %v128_v63 = vld [vmem:[#allocation5 + $0x270] sm:$0xff]  ;;  %v129_v0 = vld [vmem:[#allocation5 + $0x278] sm:$0xff]  ;;  %v1014_v2 = vpack.c.bf16 %v177_v59, %v176_v58  ;;  %v195_v5 = vld [vmem:[#allocation5 + $0x488] sm:$0xff] }
  0x53   :  { %965 = vmatpush3.bf16.msra.mxu0 %v964_v10  ;;  %v160_v1 = vld [vmem:[#allocation5 + $0x370] sm:$0xff]  ;;  %v161_v3 = vld [vmem:[#allocation5 + $0x378] sm:$0xff]  ;;  %v226_v6 = vld [vmem:[#allocation5 + $0x580] sm:$0xff]  ;;  %v984_v8 = vpack.c.bf16 %v129_v0, %v128_v63  ;;  %v1018_v10 = vpack.c.bf16 %v195_v5, %v194_v4 }
  0x54   :  { %997 = vmatpush3.bf16.msra.mxu1 %v996_v11  ;;  %967 = vmatprep.subr.bf16.mxu0 %v966_v12  ;;  %v227_v7 = vld [vmem:[#allocation5 + $0x588] sm:$0xff]  ;;  %v1016_v9 = vpack.c.bf16 %v161_v3, %v160_v1  ;;  %v178_v11 = vld [vmem:[#allocation5 + $0x400] sm:$0xff]  ;;  %v197_v17 = vld [vmem:[#allocation5 + $0x498] sm:$0xff] }
  0x55   :  { %999 = vmatprep.subr.bf16.mxu1 %v998_v16  ;;  %v179_v12 = vld [vmem:[#allocation5 + $0x408] sm:$0xff]  ;;  %v210_v13 = vld [vmem:[#allocation5 + $0x500] sm:$0xff]  ;;  %v1050_v14 = vpack.c.bf16 %v227_v7, %v226_v6  ;;  %v196_v16 = vld [vmem:[#allocation5 + $0x490] sm:$0xff] }
  0x56   :  { %v211_v15 = vld [vmem:[#allocation5 + $0x508] sm:$0xff]  ;;  %v228_v18 = vld [vmem:[#allocation5 + $0x590] sm:$0xff]  ;;  %v229_v19 = vld [vmem:[#allocation5 + $0x598] sm:$0xff]  ;;  %v1020_v21 = vpack.c.bf16 %v179_v12, %v178_v11  ;;  %v1022_v24 = vpack.c.bf16 %v197_v17, %v196_v16 }
  0x57   :  { %969 = vmatpush3.bf16.msra.mxu0 %v968_v22  ;;  %v42_v20 = vld [vmem:[#allocation2 + $0x20] sm:$0xff]  ;;  %v44_v22 = vld [vmem:[#allocation2 + $0x30] sm:$0xff]  ;;  %v1052_v23 = vpack.c.bf16 %v211_v15, %v210_v13  ;;  %v1054_v28 = vpack.c.bf16 %v229_v19, %v228_v18  ;;  %v213_v29 = vld [vmem:[#allocation5 + $0x518] sm:$0xff] }
  0x58   :  { %1001 = vmatpush3.bf16.msra.mxu1 %v1000_v25  ;;  %971 = vmatprep.subr.bf16.mxu0 %v970_v26  ;;  %v180_v25 = vld [vmem:[#allocation5 + $0x410] sm:$0xff]  ;;  %v181_v26 = vld [vmem:[#allocation5 + $0x418] sm:$0xff]  ;;  %v199_v31 = vld [vmem:[#allocation5 + $0x4a8] sm:$0xff] }
  0x59   :  { %1003 = vmatprep.subr.bf16.mxu1 %v1002_v30  ;;  %v212_v27 = vld [vmem:[#allocation5 + $0x510] sm:$0xff]  ;;  %v198_v30 = vld [vmem:[#allocation5 + $0x4a0] sm:$0xff]  ;;  %v231_v33 = vld [vmem:[#allocation5 + $0x5a8] sm:$0xff]  ;;  %v1024_v35 = vpack.c.bf16 %v181_v26, %v180_v25 }
  0x5a   :  { %v230_v32 = vld [vmem:[#allocation5 + $0x5a0] sm:$0xff]  ;;  %v47_v34 = vld [vmem:[#allocation2 + $0x48] sm:$0xff]  ;;  %v200_v44 = vld [vmem:[#allocation5 + $0x4b0] sm:$0xff] }
  0x5b   :  { %973 = vmatpush3.bf16.msra.mxu0 %v972_v36  ;;  %v49_v36 = vld [vmem:[#allocation2 + $0x58] sm:$0xff]  ;;  %v182_v39 = vld [vmem:[#allocation5 + $0x420] sm:$0xff]  ;;  %v183_v40 = vld [vmem:[#allocation5 + $0x428] sm:$0xff] }
  0x5c   :  { %1005 = vmatpush3.bf16.msra.mxu1 %v1004_v37  ;;  %975 = vmatprep.subr.bf16.mxu0 %v974_v38  ;;  %v1056_v37 = vpack.c.bf16 %v213_v29, %v212_v27  ;;  %v1026_v38 = vpack.c.bf16 %v199_v31, %v198_v30  ;;  %v214_v41 = vld [vmem:[#allocation5 + $0x520] sm:$0xff]  ;;  %v215_v43 = vld [vmem:[#allocation5 + $0x528] sm:$0xff]  ;;  %v201_v45 = vld [vmem:[#allocation5 + $0x4b8] sm:$0xff] }
  0x5d   :  { %1007 = vmatprep.subr.bf16.mxu1 %v1006_v42  ;;  %v1058_v42 = vpack.c.bf16 %v231_v33, %v230_v32  ;;  %v232_v46 = vld [vmem:[#allocation5 + $0x5b0] sm:$0xff]  ;;  %v233_v47 = vld [vmem:[#allocation5 + $0x5b8] sm:$0xff]  ;;  %v202_v56 = vld [vmem:[#allocation5 + $0x4c0] sm:$0xff] }
  0x5e   :  { %v184_v51 = vld [vmem:[#allocation5 + $0x430] sm:$0xff]  ;;  %v185_v52 = vld [vmem:[#allocation5 + $0x438] sm:$0xff]  ;;  %v203_v57 = vld [vmem:[#allocation5 + $0x4c8] sm:$0xff] }
  0x5f   :  { %977 = vmatpush3.bf16.msra.mxu0 %v976_v48  ;;  %v1028_v48 = vpack.c.bf16 %v183_v40, %v182_v39  ;;  %v216_v53 = vld [vmem:[#allocation5 + $0x530] sm:$0xff]  ;;  %v217_v55 = vld [vmem:[#allocation5 + $0x538] sm:$0xff]  ;;  %v234_v58 = vld [vmem:[#allocation5 + $0x5c0] sm:$0xff] }
  0x60   :  { %1009 = vmatpush3.bf16.msra.mxu1 %v1008_v49  ;;  %979 = vmatprep.subr.bf16.mxu0 %v978_v50  ;;  %v1060_v49 = vpack.c.bf16 %v215_v43, %v214_v41  ;;  %v1030_v50 = vpack.c.bf16 %v201_v45, %v200_v44  ;;  %v235_v59 = vld [vmem:[#allocation5 + $0x5c8] sm:$0xff]  ;;  %v186_v63 = vld [vmem:[#allocation5 + $0x440] sm:$0xff]  ;;  %v204_v4 = vld [vmem:[#allocation5 + $0x4d0] sm:$0xff] }
  0x61   :  { %1011 = vmatprep.subr.bf16.mxu1 %v1010_v54  ;;  %v1062_v54 = vpack.c.bf16 %v233_v47, %v232_v46  ;;  %v187_v0 = vld [vmem:[#allocation5 + $0x448] sm:$0xff]  ;;  %v218_v1 = vld [vmem:[#allocation5 + $0x540] sm:$0xff]  ;;  %v205_v5 = vld [vmem:[#allocation5 + $0x4d8] sm:$0xff] }
  0x62   :  { %v219_v3 = vld [vmem:[#allocation5 + $0x548] sm:$0xff]  ;;  %v236_v6 = vld [vmem:[#allocation5 + $0x5d0] sm:$0xff]  ;;  %v237_v7 = vld [vmem:[#allocation5 + $0x5d8] sm:$0xff] }
  0x63   :  { %981 = vmatpush3.bf16.msra.mxu0 %v980_v60  ;;  %v1032_v60 = vpack.c.bf16 %v185_v52, %v184_v51  ;;  %v188_v11 = vld [vmem:[#allocation5 + $0x450] sm:$0xff]  ;;  %v189_v12 = vld [vmem:[#allocation5 + $0x458] sm:$0xff]  ;;  %v206_v16 = vld [vmem:[#allocation5 + $0x4e0] sm:$0xff] }
  0x64   :  { %1013 = vmatpush3.bf16.msra.mxu1 %v1012_v61  ;;  %983 = vmatprep.subr.bf16.mxu0 %v982_v62  ;;  %v1064_v61 = vpack.c.bf16 %v217_v55, %v216_v53  ;;  %v1034_v62 = vpack.c.bf16 %v203_v57, %v202_v56  ;;  %v220_v13 = vld [vmem:[#allocation5 + $0x550] sm:$0xff]  ;;  %v221_v15 = vld [vmem:[#allocation5 + $0x558] sm:$0xff]  ;;  %v207_v17 = vld [vmem:[#allocation5 + $0x4e8] sm:$0xff] }
  0x65   :  { %1015 = vmatprep.subr.bf16.mxu1 %v1014_v2  ;;  %v1066_v2 = vpack.c.bf16 %v235_v59, %v234_v58  ;;  %v238_v18 = vld [vmem:[#allocation5 + $0x5e0] sm:$0xff]  ;;  %v239_v19 = vld [vmem:[#allocation5 + $0x5e8] sm:$0xff]  ;;  %v209_v29 = vld [vmem:[#allocation5 + $0x4f8] sm:$0xff] }
  0x66   :  { %v222_v25 = vld [vmem:[#allocation5 + $0x560] sm:$0xff]  ;;  %v1074_v26 = vpack.c.bf16 %v239_v19, %v238_v18  ;;  %v223_v27 = vld [vmem:[#allocation5 + $0x568] sm:$0xff]  ;;  %v240_v30 = vld [vmem:[#allocation5 + $0x5f0] sm:$0xff] }
  0x67   :  { %985 = vmatpush3.bf16.msra.mxu0 %v984_v8  ;;  %v1036_v8 = vpack.c.bf16 %v187_v0, %v186_v63  ;;  %v241_v31 = vld [vmem:[#allocation5 + $0x5f8] sm:$0xff]  ;;  %v1076_v33 = vpack.c.bf16 %v223_v27, %v222_v25  ;;  %v48_v43 = vld [vmem:[#allocation2 + $0x50] sm:$0xff] }
  0x68   :  { %1017 = vmatpush3.bf16.msra.mxu1 %v1016_v9  ;;  %1019 = vmatprep.subr.bf16.mxu0 %v1018_v10  ;;  %v1068_v9 = vpack.c.bf16 %v219_v3, %v218_v1  ;;  %v1038_v10 = vpack.c.bf16 %v205_v5, %v204_v4  ;;  %v225_v39 = vld [vmem:[#allocation5 + $0x578] sm:$0xff] }
  0x69   :  { %1051 = vmatprep.subr.bf16.mxu1 %v1050_v14  ;;  %v1070_v14 = vpack.c.bf16 %v237_v7, %v236_v6 }
  0x6a   :  { %447 = vmatmul.mubr.f32.vlgmr.msra.gmra.mrb[2].mxu0 %v42_v20  ;;  %v1040_v20 = vpack.c.bf16 %v189_v12, %v188_v11 }
  0x6b   :  { %1021 = vmatpush3.bf16.msra.mxu0 %v1020_v21  ;;  %517 = vmatmul.mubr.f32.vlgmr.msra.gmra.mrb[2].mxu1 %v44_v22  ;;  %v1072_v21 = vpack.c.bf16 %v221_v15, %v220_v13  ;;  %v1042_v22 = vpack.c.bf16 %v207_v17, %v206_v16 }
  0x6c   :  { %1053 = vmatpush3.bf16.msra.mxu1 %v1052_v23  ;;  %1023 = vmatprep.subr.bf16.mxu0 %v1022_v24  ;;  %v190_v23 = vld [vmem:[#allocation5 + $0x460] sm:$0xff]  ;;  %v191_v24 = vld [vmem:[#allocation5 + $0x468] sm:$0xff] }
  0x6d   :  { %1055 = vmatprep.subr.bf16.mxu1 %v1054_v28  ;;  %586 = vmatprep.mubr.f32.mxu0 %v47_v34  ;;  %v208_v28 = vld [vmem:[#allocation5 + $0x4f0] sm:$0xff]  ;;  %v1044_v32 = vpack.c.bf16 %v191_v24, %v190_v23 }
  0x6e   :  { %656 = vmatprep.mubr.f32.mxu1 %v49_v36  ;;  %v1046_v34 = vpack.c.bf16 %v209_v29, %v208_v28  ;;  %v193_v36 = vld [vmem:[#allocation5 + $0x478] sm:$0xff] }
  0x6f   :  { %1025 = vmatpush3.bf16.msra.mxu0 %v1024_v35  ;;  %v192_v35 = vld [vmem:[#allocation5 + $0x470] sm:$0xff] }
  0x70   :  { %1057 = vmatpush3.bf16.msra.mxu1 %v1056_v37  ;;  %1027 = vmatprep.subr.bf16.mxu0 %v1026_v38  ;;  %v1078_v37 = vpack.c.bf16 %v241_v31, %v240_v30  ;;  %v224_v38 = vld [vmem:[#allocation5 + $0x570] sm:$0xff]  ;;  %v1048_v40 = vpack.c.bf16 %v193_v36, %v192_v35 }
  0x71   :  { %1059 = vmatprep.subr.bf16.mxu1 %v1058_v42  ;;  %v1080_v41 = vpack.c.bf16 %v225_v39, %v224_v38  ;;  %v46_v42 = vld [vmem:[#allocation2 + $0x40] sm:$0xff] }
  0x73   :  { %1029 = vmatpush3.bf16.msra.mxu0 %v1028_v48 }
  0x74   :  { %1061 = vmatpush3.bf16.msra.mxu1 %v1060_v49  ;;  %1031 = vmatprep.subr.bf16.mxu0 %v1030_v50 }
  0x75   :  { %1063 = vmatprep.subr.bf16.mxu1 %v1062_v54 }
  0x77   :  { %1033 = vmatpush3.bf16.msra.mxu0 %v1032_v60 }
  0x78   :  { %1065 = vmatpush3.bf16.msra.mxu1 %v1064_v61  ;;  %1035 = vmatprep.subr.bf16.mxu0 %v1034_v62 }
  0x79   :  { %1067 = vmatprep.subr.bf16.mxu1 %v1066_v2 }
  0x7b   :  { %1037 = vmatpush3.bf16.msra.mxu0 %v1036_v8 }
  0x7c   :  { %1069 = vmatpush3.bf16.msra.mxu1 %v1068_v9  ;;  %1039 = vmatprep.subr.bf16.mxu0 %v1038_v10 }
  0x7d   :  { %1071 = vmatprep.subr.bf16.mxu1 %v1070_v14 }
  0x7f   :  { %1041 = vmatpush3.bf16.msra.mxu0 %v1040_v20 }
  0x80   :  { %1073 = vmatpush3.bf16.msra.mxu1 %v1072_v21  ;;  %1043 = vmatprep.subr.bf16.mxu0 %v1042_v22 }
  0x81   :  { %1075 = vmatprep.subr.bf16.mxu1 %v1074_v26 }
  0x83   :  { %1045 = vmatpush3.bf16.msra.mxu0 %v1044_v32 }
  0x84   :  { %1077 = vmatpush3.bf16.msra.mxu1 %v1076_v33  ;;  %1047 = vmatprep.subr.bf16.mxu0 %v1046_v34 }
  0x85   :  { %1079 = vmatprep.subr.bf16.mxu1 %v1078_v37 }
  0x87   :  { %1049 = vmatpush3.bf16.msra.mxu0 %v1048_v40 }
  0x88   :  { %1081 = vmatpush3.bf16.msra.mxu1 %v1080_v41 }
  0x8a   :  { %587 = vmatmul.mubr.f32.vlgmr.msra.gmra.mrb[4].mxu0 %v46_v42 }
  0x8b   :  { %657 = vmatmul.mubr.f32.vlgmr.msra.gmra.mrb[4].mxu1 %v48_v43 }
 0x11d   :  { %v712_v44 = vpop.f32.mrb[0].mxu0 }
 0x11e   :  { %v747_v45 = vpop.f32.mrb[0].mxu1  ;;  %v713_v46 = vpop.f32.mrb[1].mxu0 }
 0x11f   :  { %v714_v47 = vadd.f32 %v713_v46, %v712_v44  ;;  %v748_v48 = vpop.f32.mrb[1].mxu1 }
 0x120   :  { %v749_v49 = vadd.f32 %v748_v48, %v747_v45 }
 0x122   :  { %v379_v50 = vadd.f32 %v749_v49, %v714_v47 }
 0x13d   :  { %v782_v51 = vpop.f32.mrb[2].mxu0 }
 0x13e   :  { %v783_v52 = vpop.f32.mrb[3].mxu0  ;;  %v817_v53 = vpop.f32.mrb[2].mxu1 }
 0x13f   :  { %v784_v54 = vadd.f32 %v783_v52, %v782_v51  ;;  %v818_v55 = vpop.f32.mrb[3].mxu1 }
 0x140   :  { %v819_v56 = vadd.f32 %v818_v55, %v817_v53 }
 0x141   :  { %v449_v57 = vadd.f32 %v784_v54, %v379_v50 }
 0x143   :  { %v519_v58 = vadd.f32 %v819_v56, %v449_v57 }
 0x15d   :  { %v852_v59 = vpop.f32.mrb[4].mxu0 }
 0x15e   :  { %v853_v60 = vpop.f32.mrb[5].mxu0  ;;  %v887_v61 = vpop.f32.mrb[4].mxu1 }
 0x15f   :  { %v854_v62 = vadd.f32 %v853_v60, %v852_v59  ;;  %v888_v63 = vpop.f32.mrb[5].mxu1 }
 0x160   :  { %v889_v0 = vadd.f32 %v888_v63, %v887_v61 }
 0x161   :  { %v589_v1 = vadd.f32 %v854_v62, %v519_v58 }
 0x163   :  { %v659_v2 = vadd.f32 %v889_v0, %v589_v1 }
 0x165   :  { %1087 = vtanh.f32 %v659_v2 }
 0x16f   :  { %v1088_v3 = vpop.eup %1087 }
 0x170   :  { %663 = vst [vmem:[#allocation7] sm:$0xff] %v1088_v3 }
 0x171   :  { %1144 = shalt.err (!%p1141_p6)
}
 0x172   :  { %s1145_s10 = scalar_lea.hbm %s1226_s2, 128 }
 0x173   :  { %p1146_p7 = scmp.ne.s32.totalorder %s1226_s2, %s1145_s10  ;;  %p1149_p8 = scmp.lt.u32.totalorder %s1145_s10, %s1226_s2 }
 0x175   :  { %p1151_p9 = pnand %p1149_p8, %p1146_p7 }
 0x177   :  { %1154 = shalt.err (!%p1151_p9)
}
 0x178   :  { %673 = dma.vmem_to_hbm [thread:$0]  %s671_s6, 128, %s1226_s2, [#allocation4]  }
 0x179   :  { %1159 = dma.done.wait [#allocation4], 128  }
 0x17a   :  { %1160 = vsyncadd [#allocation4], 4294967168 }
 0x17b   :  { %677 = vsyncpa [#allocation3], 1 }
 0x17c   :  { %678 = vsyncpa [#allocation6], 1 }
 0x17d   :  { %679 = vsyncpa [#allocation4], 1 }

</bundles_post_ra>
